<compile_context>
chip_gen: v6e
topology: v6e:2x2x1
jax: 0.10.0
libtpu: 0.0.40
codegen_flags: <defaults>
</compile_context>

<pallas_src>
import jax
import jax.numpy as jnp
from jax.experimental import pallas as pl
from jax.experimental.pallas import tpu as pltpu


_LANE = 128      # TPU lane width (last-dim granularity)
_SUBLANE = 16    # safe sublane granularity (covers bf16 packing)


def _round_up(x, m):
    return ((x + m - 1) // m) * m


def _adapter_kernel(x_ref, w1_ref, w2_ref, o_ref):
    """One row tile: y = relu(relu(x @ W1t) @ W2t).

    x_ref : (tm, c_in_p)     activation row tile (original or compute dtype)
    w1_ref: (c_in_p, hid_p)  full weight, resident in VMEM across the grid
    w2_ref: (hid_p, c_in_p)  full weight, resident in VMEM across the grid
    o_ref : (tm, c_in_p)     output tile (original activation dtype)
    """
    x = x_ref[...].astype(w1_ref.dtype)                       # no-op if already bf16
    h = jnp.dot(x, w1_ref[...], preferred_element_type=jnp.float32)
    h = jnp.maximum(h, 0.0)                                   # ReLU 1 (f32)
    y = jnp.dot(h.astype(w2_ref.dtype), w2_ref[...],
                preferred_element_type=jnp.float32)
    o_ref[...] = jnp.maximum(y, 0.0).astype(o_ref.dtype)      # ReLU 2


def prepare_adapter_weights(w1, w2, *, compute_dtype=jnp.bfloat16):
    """One-time (init-time) weight conversion — keep out of the hot path.

    w1: (hidden, c_in), w2: (c_in, hidden)  [PyTorch nn.Linear layout]
      -> (in, out) layout, zero-padded to lane-dense (multiple-of-128) shapes,
         cast to the MXU compute dtype (bf16 by default).
    Zero padding is numerically inert (no bias; ReLU(0) == 0).
    """
    hidden, c_in = w1.shape
    assert w2.shape == (c_in, hidden)
    c_in_p = _round_up(c_in, _LANE)
    hid_p = _round_up(hidden, _LANE)
    w1_t = jnp.zeros((c_in_p, hid_p), compute_dtype)
    w1_t = w1_t.at[:c_in, :hidden].set(w1.T.astype(compute_dtype))
    w2_t = jnp.zeros((hid_p, c_in_p), compute_dtype)
    w2_t = w2_t.at[:hidden, :c_in].set(w2.T.astype(compute_dtype))
    return w1_t, w2_t


def _pick_tm(n_rows, c_in_p, hid_p, x_bytes, w_bytes, out_bytes, tm_max, budget):
    """Largest row tile (multiple of 16, <= tm_max) whose VMEM footprint fits."""
    weights = 2 * c_in_p * hid_p * w_bytes                 # both weights, 1 copy each
    tm = min(_round_up(tm_max, _SUBLANE),
             _round_up(max(n_rows, 1), _SUBLANE))
    while True:
        need = (weights
                + 2 * tm * c_in_p * x_bytes                # x tile, double-buffered
                + 2 * tm * c_in_p * out_bytes              # out tile, double-buffered
                + tm * c_in_p * w_bytes                    # x cast to compute dtype
                + tm * hid_p * (4 + w_bytes)               # h (f32) + h cast
                + tm * c_in_p * 4)                         # y (f32)
        if need <= budget or tm <= _SUBLANE:
            return tm, need
        tm = max(_SUBLANE, _round_up(tm // 2, _SUBLANE))


def adapter_forward(x, w1_t, w2_t, *, tm=512, vmem_budget_bytes=40 << 20):
    """Adapter forward pass: y = relu(relu(x @ W1^T) @ W2^T), bias-free.

    x    : (..., c_in) activations (output keeps x.dtype)
    w1_t : (c_in_p, hid_p), w2_t: (hid_p, c_in_p) from prepare_adapter_weights.
    """
    orig_shape = x.shape
    c_in = orig_shape[-1]
    x2 = x.reshape(-1, c_in)
    n = x2.shape[0]

    c_in_p, hid_p = w1_t.shape
    assert w2_t.shape == (hid_p, c_in_p)
    assert c_in <= c_in_p

    compute_dtype = w1_t.dtype
    out_dtype = x.dtype
    x_bytes = jnp.dtype(x.dtype).itemsize
    w_bytes = jnp.dtype(compute_dtype).itemsize
    out_bytes = jnp.dtype(out_dtype).itemsize

    tm, need = _pick_tm(n, c_in_p, hid_p, x_bytes, w_bytes, out_bytes, tm,
                        vmem_budget_bytes)
    n_pad = _round_up(max(n, 1), tm)

    needs_pad = (n_pad != n) or (c_in_p != c_in)
    if needs_pad:
        # Fuse the compute-dtype cast into the single padding pass (smallest
        # possible HBM traffic when a pad is unavoidable).
        xp = jnp.pad(x2.astype(compute_dtype),
                     ((0, n_pad - n), (0, c_in_p - c_in)))
    else:
        # No wrapper pass over x at all: DMA the raw tiles, cast in-kernel.
        xp = x2

    grid = (n_pad // tm,)
    vmem_limit = int(min(max(need + (8 << 20), 32 << 20), 64 << 20))

    flops = 4 * n_pad * c_in_p * hid_p           # two matmuls, 2*M*K*N each
    bytes_accessed = (xp.size * jnp.dtype(xp.dtype).itemsize
                      + n_pad * c_in_p * out_bytes
                      + 2 * c_in_p * hid_p * w_bytes)

    out = pl.pallas_call(
        _adapter_kernel,
        out_shape=jax.ShapeDtypeStruct((n_pad, c_in_p), out_dtype),
        grid_spec=pltpu.PrefetchScalarGridSpec(
            num_scalar_prefetch=0,
            grid=grid,
            in_specs=[
                # Activation row tile: pipelined (double-buffered) over the grid.
                pl.BlockSpec((tm, c_in_p), lambda i: (i, 0)),
                # Weights: whole arrays resident in VMEM once — no per-step DMA,
                # no double buffering of constant blocks.
                pl.BlockSpec(memory_space=pltpu.MemorySpace.VMEM),
                pl.BlockSpec(memory_space=pltpu.MemorySpace.VMEM),
            ],
            out_specs=pl.BlockSpec((tm, c_in_p), lambda i: (i, 0)),
        ),
        compiler_params=pltpu.CompilerParams(
            dimension_semantics=("parallel",),   # row tiles shard across TCs (v7x)
            vmem_limit_bytes=vmem_limit,
        ),
        cost_estimate=pl.CostEstimate(flops=flops, transcendentals=0,
                                      bytes_accessed=bytes_accessed),
    )(xp, w1_t, w2_t)

    if needs_pad:
        out = out[:n, :c_in]
    return out.reshape(orig_shape)


def adapter_reference_f32(x, w1, w2):
    h = jnp.maximum(x @ w1.T, 0.0)
    return jnp.maximum(h @ w2.T, 0.0)


def adapter_reference_bf16(x, w1, w2):
    cd = jnp.bfloat16
    h = jnp.maximum(jnp.dot(x.astype(cd), w1.T.astype(cd),
                            preferred_element_type=jnp.float32), 0.0)
    y = jnp.maximum(jnp.dot(h.astype(cd), w2.T.astype(cd),
                            preferred_element_type=jnp.float32), 0.0)
    return y.astype(x.dtype)


def _make_case(key, n, c_in, reduction):
    hidden = c_in // reduction
    kx, k1, k2 = jax.random.split(key, 3)
    x = jax.random.normal(kx, (n, c_in), dtype=jnp.float32)
    b1 = 1.0 / (c_in ** 0.5)
    b2 = 1.0 / (hidden ** 0.5)
    # PyTorch nn.Linear layout: (out_features, in_features), bias-free.
    w1 = jax.random.uniform(k1, (hidden, c_in), minval=-b1, maxval=b1,
                            dtype=jnp.float32)
    w2 = jax.random.uniform(k2, (c_in, hidden), minval=-b2, maxval=b2,
                            dtype=jnp.float32)
    return x, w1, w2


if __name__ == "__main__":
    root = jax.random.PRNGKey(0)
    k_a, k_b, k_c = jax.random.split(root, 3)

    # Case 1: small shapes matching the module (tokens x features, reduction=4);
    # exercises feature-lane padding, single row tile.
    x, w1, w2 = _make_case(k_a, n=8, c_in=32, reduction=4)
    w1_t, w2_t = prepare_adapter_weights(w1, w2)   # init-time, not hot path
    out = jax.block_until_ready(adapter_forward(x, w1_t, w2_t))
    assert out.shape == x.shape and out.dtype == x.dtype
    assert jnp.allclose(out, adapter_reference_bf16(x, w1, w2),
                        atol=1e-2, rtol=1e-2), "mismatch vs bf16 ref (case 1)"
    assert jnp.allclose(out, adapter_reference_f32(x, w1, w2),
                        atol=5e-2, rtol=5e-2), "mismatch vs f32 ref (case 1)"

    # Case 2: multi-tile pipelined grid (3 row tiles of 16) + hidden padding.
    x2, w1b, w2b = _make_case(k_b, n=48, c_in=256, reduction=4)
    w1b_t, w2b_t = prepare_adapter_weights(w1b, w2b)
    out2 = jax.block_until_ready(adapter_forward(x2, w1b_t, w2b_t, tm=16))
    assert out2.shape == x2.shape
    assert jnp.allclose(out2, adapter_reference_bf16(x2, w1b, w2b),
                        atol=1e-2, rtol=1e-2), "mismatch (case 2, tiled)"

    # Case 3: no-padding fast path (c_in % 128 == 0, rows divide tm) — x is
    # DMA'd in f32 and cast inside the kernel.
    x3, w1c, w2c = _make_case(k_c, n=64, c_in=256, reduction=4)
    w1c_t, w2c_t = prepare_adapter_weights(w1c, w2c)
    out3 = jax.block_until_ready(adapter_forward(x3, w1c_t, w2c_t, tm=32))
    assert out3.shape == x3.shape
    assert jnp.allclose(out3, adapter_reference_bf16(x3, w1c, w2c),
                        atol=1e-2, rtol=1e-2), "mismatch (case 3, no-pad path)"

    print("KERNEL_OK")
</pallas_src>

<mosaic_0001>
module attributes {stable_mosaic.version = 11 : i64} {
  func.func @_adapter_kernel(%arg0: i32, %arg1: memref<16x128xbf16, #tpu.memory_space<vmem>>, %arg2: memref<128x128xbf16, #tpu.memory_space<vmem>>, %arg3: memref<128x128xbf16, #tpu.memory_space<vmem>>, %arg4: memref<16x128xf32, #tpu.memory_space<vmem>>) attributes {dimension_semantics = [#tpu.dimension_semantics<parallel>], iteration_bounds = array<i64: 1>, scalar_prefetch = 0 : i64, scratch_operands = 0 : i64, tpu.core_type = #tpu.core_type<tc>, window_params = [{transform_indices = @transform_0, window_bounds = array<i64: 16, 128>}, {pipeline_mode = #tpu.pipeline_mode<synchronous>, transform_indices = @transform_1, window_bounds = array<i64: 128, 128>}, {pipeline_mode = #tpu.pipeline_mode<synchronous>, transform_indices = @transform_2, window_bounds = array<i64: 128, 128>}, {transform_indices = @transform_3, window_bounds = array<i64: 16, 128>}]} {
    %c0 = arith.constant 0 : index
    %c0_0 = arith.constant 0 : index
    %0 = vector.load %arg1[%c0, %c0_0] : memref<16x128xbf16, #tpu.memory_space<vmem>>, vector<16x128xbf16>
    %c0_1 = arith.constant 0 : index
    %c0_2 = arith.constant 0 : index
    %1 = vector.load %arg2[%c0_1, %c0_2] : memref<128x128xbf16, #tpu.memory_space<vmem>>, vector<128x128xbf16>
    %cst = arith.constant dense<0.000000e+00> : vector<16x128xf32>
    %2 = tpu.matmul %0, %1, %cst {dimension_numbers = #tpu.dot_dimension_numbers<[1], [0], [0], [1], [0, 0, 1, 1], [], []>} : vector<16x128xbf16>, vector<128x128xbf16>, vector<16x128xf32> -> vector<16x128xf32>
    %cst_3 = arith.constant 0.000000e+00 : f32
    %3 = vector.broadcast %cst_3 : f32 to vector<16x128xf32>
    %4 = arith.maximumf %2, %3 : vector<16x128xf32>
    %5 = arith.truncf %4 : vector<16x128xf32> to vector<16x128xbf16>
    %c0_4 = arith.constant 0 : index
    %c0_5 = arith.constant 0 : index
    %6 = vector.load %arg3[%c0_4, %c0_5] : memref<128x128xbf16, #tpu.memory_space<vmem>>, vector<128x128xbf16>
    %cst_6 = arith.constant dense<0.000000e+00> : vector<16x128xf32>
    %7 = tpu.matmul %5, %6, %cst_6 {dimension_numbers = #tpu.dot_dimension_numbers<[1], [0], [0], [1], [0, 0, 1, 1], [], []>} : vector<16x128xbf16>, vector<128x128xbf16>, vector<16x128xf32> -> vector<16x128xf32>
    %cst_7 = arith.constant 0.000000e+00 : f32
    %8 = vector.broadcast %cst_7 : f32 to vector<16x128xf32>
    %9 = arith.maximumf %7, %8 : vector<16x128xf32>
    %c0_8 = arith.constant 0 : index
    %c0_9 = arith.constant 0 : index
    %10 = vector.load %arg4[%c0_8, %c0_9] : memref<16x128xf32, #tpu.memory_space<vmem>>, vector<16x128xf32>
    tpu.vector_store %arg4[%c0_8, %c0_9], %9 {strides = array<i32>} : memref<16x128xf32, #tpu.memory_space<vmem>>, vector<16x128xf32>,
    return
  }
  func.func @transform_0(%arg0: i32) -> (i32, i32) {
    %c0_i32 = arith.constant 0 : i32
    %c0_i32_0 = arith.constant 0 : i32
    return %arg0, %c0_i32 : i32, i32
  }
  func.func @transform_1(%arg0: i32) -> (i32, i32) {
    %c0_i32 = arith.constant 0 : i32
    %c0_i32_0 = arith.constant 0 : i32
    %c0_i32_1 = arith.constant 0 : i32
    return %c0_i32, %c0_i32_0 : i32, i32
  }
  func.func @transform_2(%arg0: i32) -> (i32, i32) {
    %c0_i32 = arith.constant 0 : i32
    %c0_i32_0 = arith.constant 0 : i32
    %c0_i32_1 = arith.constant 0 : i32
    return %c0_i32, %c0_i32_0 : i32, i32
  }
  func.func @transform_3(%arg0: i32) -> (i32, i32) {
    %c0_i32 = arith.constant 0 : i32
    %c0_i32_0 = arith.constant 0 : i32
    return %arg0, %c0_i32 : i32, i32
  }
}

</mosaic_0001>

<bundles_post_ra>
// kernel: tpu_custom_call.1
= control target key start
LH: loop header
LB: loop body
LE: loop exit
PB: predicated region body
PF: predicated region fallthrough
CT: control target
= control target key end

     0   :  { %8 = vsyncpa [#allocation3], 0  ;;  %s530_s0 = inlined_call_operand.hbm [shape: bf16[16,128], index: 0, kind: input, shape index: {}]   ;;  %s531_s1 = inlined_call_operand.hbm [shape: bf16[128,128], index: 1, kind: input, shape index: {}]   ;;  %s532_s2 = inlined_call_operand.hbm [shape: bf16[128,128], index: 2, kind: input, shape index: {}]   ;;  %s533_s3 = inlined_call_operand.hbm [shape: f32[16,128], index: 3, kind: output, shape index: {}]  }
   0x1   :  { %9 = vsyncpa [#allocation6], 0 }
   0x2   :  { %10 = vsyncpa [#allocation4], 0  ;;  %s488_s12 = smov [#allocation5]   ;;  %s489_s14 = smov [#allocation2]  }
   0x3   :  { %s28_s13 = sshll.u32 %s488_s12, 4  ;;  %s16_s15 = sshll.u32 %s489_s14, 4  ;;  %s29_s13 = int_to_ptr.vmem [resolvable:$true] %s28_s13  ;;  %s17_s15 = int_to_ptr.vmem [resolvable:$true] %s16_s15 }
   0x4   :  { %s410_s16 = scalar_lea.vmem %s29_s13, 1024  ;;  %p415_p1 = scmp.lt.s32.totalorder %s29_s13, %s29_s13 }
   0x5   :  { %p411_p0 = scmp.ne.s32.totalorder %s29_s13, %s410_s16  ;;  %p416_p2 = scmp.lt.s32.totalorder %s410_s16, %s410_s16 }
   0x7   :  { %p417_p3 = por %p416_p2, %p415_p1 }
   0x9   :  { %p418_p4 = pnand %p417_p3, %p411_p0 }
   0xb   :  { %421 = shalt.err (!%p418_p4)
}
   0xc   :  { %s490_s17 = smov 64   ;;  %s491_s18 = smov 4  }
   0xd   :  { %34 = dma.hbm_to_vmem [thread:$0]  %s531_s1, 1024, %s29_s13, [#allocation6], %s490_s17, %s490_s17, %s491_s18  }
   0xe   :  { %s430_s21 = scalar_lea.vmem %s17_s15, 128  ;;  %p435_p6 = scmp.lt.s32.totalorder %s17_s15, %s17_s15 }
   0xf   :  { %p431_p5 = scmp.ne.s32.totalorder %s17_s15, %s430_s21  ;;  %p436_p7 = scmp.lt.s32.totalorder %s430_s21, %s430_s21 }
  0x11   :  { %p437_p8 = por %p436_p7, %p435_p6 }
  0x13   :  { %p438_p9 = pnand %p437_p8, %p431_p5 }
  0x15   :  { %441 = shalt.err (!%p438_p9)
}
  0x16   :  { %22 = dma.hbm_to_vmem [thread:$0]  %s530_s0, 128, %s17_s15, [#allocation3], %s490_s17, %s490_s17, %s491_s18  }
  0x17   :  { %s492_s24 = smov [#allocation7]  }
  0x18   :  { %s40_s25 = sshll.u32 %s492_s24, 4  ;;  %s41_s25 = int_to_ptr.vmem [resolvable:$true] %s40_s25 }
  0x19   :  { %s450_s26 = scalar_lea.vmem %s41_s25, 1024  ;;  %p455_p11 = scmp.lt.s32.totalorder %s41_s25, %s41_s25 }
  0x1a   :  { %p451_p10 = scmp.ne.s32.totalorder %s41_s25, %s450_s26  ;;  %p456_p12 = scmp.lt.s32.totalorder %s450_s26, %s450_s26 }
  0x1c   :  { %p457_p13 = por %p456_p12, %p455_p11 }
  0x1e   :  { %p458_p0 = pnand %p457_p13, %p451_p10 }
  0x20   :  { %461 = shalt.err (!%p458_p0)
}
  0x21   :  { %46 = dma.hbm_to_vmem [thread:$0]  %s532_s2, 1024, %s41_s25, [#allocation6], %s490_s17, %s490_s17, %s491_s18  }
  0x22   :  { %482 = dma.done.wait [#allocation3], 128  }
  0x23   :  { %483 = vsyncadd [#allocation3], 4294967168 }
  0x24   :  { %484 = dma.done.wait [#allocation6], 2048  }
  0x25   :  { %485 = vsyncadd [#allocation6], 4294965248  ;;  %v493_v0 = vmov 0.0   ;;  %vm494_vm0 = vmmov 0   ;;  %v385_v1 = vld [vmem:[#allocation5 + $0x38] sm:$0xff]   ;;  %v386_v2 = vld [vmem:[#allocation5 + $0x30] sm:$0xff]  }
  0x26   :  { %335 = vmatprep.subr.bf16.mxu0 %v493_v0  ;;  %351 = vmatprep.mubr.msk.bf16.mxu0 %vm494_vm0, %v493_v0  ;;  %v387_v3 = vld [vmem:[#allocation5 + $0x28] sm:$0xff]   ;;  %v394_v4 = vld [vmem:[#allocation7 + $0x38] sm:$0xff]   ;;  %v388_v5 = vld [vmem:[#allocation5 + $0x20] sm:$0xff]   ;;  %s495_s0 = smov [#allocation8]  }
  0x27   :  { %355 = vmatprep.subr.bf16.mxu1 %v493_v0  ;;  %371 = vmatprep.mubr.msk.bf16.mxu1 %vm494_vm0, %v493_v0  ;;  %v395_v6 = vld [vmem:[#allocation7 + $0x30] sm:$0xff]   ;;  %v389_v7 = vld [vmem:[#allocation5 + $0x18] sm:$0xff]   ;;  %v396_v8 = vld [vmem:[#allocation7 + $0x28] sm:$0xff]   ;;  %s287_s2 = sshll.u32 %s495_s0, 4  ;;  %s288_s2 = int_to_ptr.vmem [resolvable:$true] %s287_s2 }
  0x28   :  { %336 = vmatpush3.bf16.msra.mxu0 %v385_v1  ;;  %356 = vmatpush3.bf16.msra.mxu1 %v394_v4  ;;  %v390_v9 = vld [vmem:[#allocation5 + $0x10] sm:$0xff]   ;;  %v397_v10 = vld [vmem:[#allocation7 + $0x20] sm:$0xff]   ;;  %v391_v11 = vld [vmem:[#allocation5 + $0x8] sm:$0xff]   ;;  %s462_s28 = scalar_lea.vmem %s288_s2, 256  ;;  %p467_p2 = scmp.lt.s32.totalorder %s288_s2, %s288_s2 }
  0x29   :  { %337 = vmatprep.subr.bf16.mxu0 %v493_v0  ;;  %357 = vmatprep.subr.bf16.mxu1 %v493_v0  ;;  %v398_v12 = vld [vmem:[#allocation7 + $0x18] sm:$0xff]   ;;  %v392_v13 = vld [vmem:[#allocation5] sm:$0xff]   ;;  %v399_v14 = vld [vmem:[#allocation7 + $0x10] sm:$0xff]   ;;  %p463_p1 = scmp.ne.s32.totalorder %s288_s2, %s462_s28  ;;  %p468_p3 = scmp.lt.s32.totalorder %s462_s28, %s462_s28 }
  0x2a   :  { %v393_v15 = vld [vmem:[#allocation2] sm:$0xff]   ;;  %v400_v16 = vld [vmem:[#allocation7 + $0x8] sm:$0xff]   ;;  %v401_v17 = vld [vmem:[#allocation7] sm:$0xff]  }
  0x2b   :  { %p469_p4 = por %p468_p3, %p467_p2 }
  0x2c   :  { %338 = vmatpush3.bf16.msra.mxu0 %v386_v2  ;;  %358 = vmatpush3.bf16.msra.mxu1 %v395_v6 }
  0x2d   :  { %339 = vmatprep.subr.bf16.mxu0 %v493_v0  ;;  %359 = vmatprep.subr.bf16.mxu1 %v493_v0  ;;  %p470_p5 = pnand %p469_p4, %p463_p1 }
  0x30   :  { %340 = vmatpush3.bf16.msra.mxu0 %v387_v3  ;;  %360 = vmatpush3.bf16.msra.mxu1 %v396_v8 }
  0x31   :  { %341 = vmatprep.subr.bf16.mxu0 %v493_v0  ;;  %361 = vmatprep.subr.bf16.mxu1 %v493_v0 }
  0x34   :  { %342 = vmatpush3.bf16.msra.mxu0 %v388_v5  ;;  %362 = vmatpush3.bf16.msra.mxu1 %v397_v10 }
  0x35   :  { %343 = vmatprep.subr.bf16.mxu0 %v493_v0  ;;  %363 = vmatprep.subr.bf16.mxu1 %v493_v0 }
  0x38   :  { %344 = vmatpush3.bf16.msra.mxu0 %v389_v7  ;;  %364 = vmatpush3.bf16.msra.mxu1 %v398_v12 }
  0x39   :  { %345 = vmatprep.subr.bf16.mxu0 %v493_v0  ;;  %365 = vmatprep.subr.bf16.mxu1 %v493_v0 }
  0x3c   :  { %346 = vmatpush3.bf16.msra.mxu0 %v390_v9  ;;  %366 = vmatpush3.bf16.msra.mxu1 %v399_v14 }
  0x3d   :  { %347 = vmatprep.subr.bf16.mxu0 %v493_v0  ;;  %367 = vmatprep.subr.bf16.mxu1 %v493_v0 }
  0x40   :  { %348 = vmatpush3.bf16.msra.mxu0 %v391_v11  ;;  %368 = vmatpush3.bf16.msra.mxu1 %v400_v16 }
  0x41   :  { %349 = vmatprep.subr.bf16.mxu0 %v493_v0  ;;  %369 = vmatprep.subr.bf16.mxu1 %v493_v0 }
  0x44   :  { %350 = vmatpush3.bf16.msra.mxu0 %v392_v13  ;;  %370 = vmatpush3.bf16.msra.mxu1 %v401_v17 }
  0x47   :  { %352 = vmatmul.mubr.bf16.vlgmr.msra.gmra.mxu0 %v393_v15 }
 0x107   :  { %v163_v18 = vpop.f32.mrf.mxu0 }
 0x108   :  { %v170_v21 = vmax.f32 %v163_v18, 0.0 }
 0x109   :  { %v353_v19 = vpop.f32.mrf.mxu0 }
 0x10b   :  { %v166_v20 = vpop.f32.mrf.mxu0 }
 0x10c   :  { %v171_v22 = vmax.f32 %v166_v20, 0.0 }
 0x10d   :  { %v354_v23 = vpop.f32.mrf.mxu0 }
 0x10e   :  { %v172_v24 = vpack.c.bf16 %v171_v22, %v170_v21 }
 0x110   :  { %372 = vmatmul.mubr.bf16.vlgmr.msra.gmra.mxu1 %v172_v24 }
 0x1d0   :  { %v271_v25 = vpop.f32.mrf.mxu1 }
 0x1d1   :  { %v278_v26 = vmax.f32 %v271_v25, 0.0 }
 0x1d2   :  { %v373_v27 = vpop.f32.mrf.mxu1 }
 0x1d3   :  { %280 = vst [vmem:[#allocation8] sm:$0xff] %v278_v26 }
 0x1d4   :  { %v274_v28 = vpop.f32.mrf.mxu1 }
 0x1d5   :  { %v279_v29 = vmax.f32 %v274_v28, 0.0 }
 0x1d6   :  { %v374_v30 = vpop.f32.mrf.mxu1 }
 0x1d7   :  { %281 = vst [vmem:[#allocation8 + $0x8] sm:$0xff] %v279_v29 }
 0x1d8   :  { %473 = shalt.err (!%p470_p5)
}
 0x1d9   :  { %s496_s29 = smov 128   ;;  %s497_s30 = smov 8  }
 0x1da   :  { %293 = dma.vmem_to_hbm [thread:$0]  %s288_s2, 256, %s533_s3, [#allocation4], %s496_s29, %s496_s29, %s497_s30  }
 0x1db   :  { %486 = dma.done.wait [#allocation4], 256  }
 0x1dc   :  { %487 = vsyncadd [#allocation4], 4294967040 }
 0x1dd   :  { %297 = vsyncpa [#allocation3], 1 }
 0x1de   :  { %298 = vsyncpa [#allocation6], 1 }
 0x1df   :  { %299 = vsyncpa [#allocation4], 1 }

</bundles_post_ra>
